<compile_context>
chip_gen: v7x
topology: tpu7x:2x2x1
jax: 0.10.0
libtpu: 0.0.40
codegen_flags: <defaults>
</compile_context>

<pallas_src>
from functools import partial

import jax
import jax.numpy as jnp
from jax import lax
from jax.experimental import pallas as pl
from jax.experimental.pallas import tpu as pltpu


def odeneth_kernel(h_ref, w1_ref, b1_ref, w2_ref, b2_ref, out_ref, *, n_steps):
    # Weight/bias loads hoisted out of the step loop (resident across steps).
    w1 = w1_ref[...]            # (Hp, Mp)
    w2 = w2_ref[...]            # (Mp, Hp)
    b1 = b1_ref[...]            # (1, Mp)  -- implicit broadcast in the add
    b2 = b2_ref[...]            # (1, Hp)
    tb = h_ref.shape[0]

    if tb >= 16 and tb % 16 == 0:
        # Two independent sub-tile chains: one half's EUP tanh hides under the
        # other half's MXU matmul (both chains in one basic block so the LLO
        # scheduler interleaves them).
        half = tb // 2

        def step(_, carry):
            h0, h1 = carry
            z0 = jnp.dot(h0, w1, preferred_element_type=jnp.float32) + b1
            z1 = jnp.dot(h1, w1, preferred_element_type=jnp.float32) + b1
            a0 = jnp.tanh(z0)
            a1 = jnp.tanh(z1)
            y0 = jnp.tanh(jnp.dot(a0, w2, preferred_element_type=jnp.float32) + b2)
            y1 = jnp.tanh(jnp.dot(a1, w2, preferred_element_type=jnp.float32) + b2)
            return y0, y1

        carry = (h_ref[:half, :], h_ref[half:, :])
        if n_steps <= 4:
            for _ in range(n_steps):          # fully visible to the scheduler
                carry = step(0, carry)
        else:
            carry = lax.fori_loop(0, n_steps, step, carry, unroll=2)
        out_ref[:half, :] = carry[0].astype(out_ref.dtype)
        out_ref[half:, :] = carry[1].astype(out_ref.dtype)
    else:
        def step(_, h):
            z1 = jnp.tanh(jnp.dot(h, w1, preferred_element_type=jnp.float32) + b1)
            return jnp.tanh(jnp.dot(z1, w2, preferred_element_type=jnp.float32) + b2)

        h = h_ref[...]                        # (TB, Hp)
        if n_steps <= 4:
            for _ in range(n_steps):
                h = step(0, h)
        else:
            h = lax.fori_loop(0, n_steps, step, h, unroll=4)
        out_ref[...] = h.astype(out_ref.dtype)


def _round_up(x, m):
    return ((x + m - 1) // m) * m


def _cdiv(a, b):
    return (a + b - 1) // b


def _pad2(x, rows, cols):
    r, c = x.shape
    return jnp.pad(x, ((0, rows - r), (0, cols - c)))


@partial(jax.jit, static_argnames=("n_steps",))
def odeneth_forward(inp, t, dt, hidden, w1, b1, w2, b2, n_steps=1):
    """Mirrors ODENetH.forward(input, t, dt, hidden) when n_steps=1.

    n_steps>1 fuses n_steps repeated applications of the net into a single
    kernel launch (weights stay resident in VMEM across steps).
    """
    del inp, t, dt  # unused by the PyTorch module's forward
    B, H = hidden.shape
    M = w1.shape[1]

    # Lane-pad features to 128, sublane-pad batch to 8. Padded weight/bias
    # columns are zero so padded feature lanes stay exactly 0 through tanh
    # (tanh(0)=0), preserving parity with the unpadded module.
    Hp = _round_up(H, 128)
    Mp = _round_up(M, 128)
    Bp0 = _round_up(B, 8)

    # Batch tile: at least 2 tiles whenever we have >= 16 rows so the
    # "parallel" grid axis shards across both TensorCores on v7x; cap at 512
    # rows to amortize per-grid-step overhead for large batches.
    if Bp0 >= 16:
        TB = min(_round_up(_cdiv(Bp0, 2), 8), 512)
    else:
        TB = Bp0
    Bp = _round_up(Bp0, TB)

    h_p = _pad2(hidden, Bp, Hp)
    w1_p = _pad2(w1, Hp, Mp)
    b1_p = _pad2(b1, 1, Mp)
    w2_p = _pad2(w2, Mp, Hp)
    b2_p = _pad2(b2, 1, Hp)

    # Advisory cost hint for XLA's scheduler (padded shapes; advisory only).
    flops = 4 * n_steps * Bp * Hp * Mp                       # two matmuls/step
    transcendentals = n_steps * Bp * (Mp + Hp)               # tanh count
    bytes_accessed = 4 * (2 * Hp * Mp + Mp + Hp + 2 * Bp * Hp)

    # VMEM budget from actual usage (double-buffered inputs/outputs) + slack,
    # instead of pinning to v7x's full 64 MiB physical VMEM.
    elt = 4
    weight_bytes = 2 * (Hp * Mp + Mp * Hp) * elt             # W1 + W2, 2 bufs
    bias_bytes = 2 * 2 * (Mp + Hp) * elt
    state_bytes = 2 * 2 * (TB * Hp) * elt                    # in + out tiles, 2 bufs
    vmem_bytes = weight_bytes + bias_bytes + state_bytes
    vmem_limit = int(min(96 << 20, _round_up(3 * vmem_bytes + (8 << 20), 1 << 20)))

    out_p = pl.pallas_call(
        partial(odeneth_kernel, n_steps=n_steps),
        out_shape=jax.ShapeDtypeStruct((Bp, Hp), hidden.dtype),
        grid_spec=pltpu.PrefetchScalarGridSpec(
            num_scalar_prefetch=0,
            grid=(Bp // TB,),                                   # batch tiles
            in_specs=[
                pl.BlockSpec((TB, Hp), lambda i: (i, 0)),       # hidden tile
                pl.BlockSpec((Hp, Mp), lambda i: (0, 0)),       # W1 (resident)
                pl.BlockSpec((1, Mp), lambda i: (0, 0)),        # b1
                pl.BlockSpec((Mp, Hp), lambda i: (0, 0)),       # W2 (resident)
                pl.BlockSpec((1, Hp), lambda i: (0, 0)),        # b2
            ],
            out_specs=pl.BlockSpec((TB, Hp), lambda i: (i, 0)),
        ),
        # Aliases the padded temp h_p to the output (saves one HBM buffer for
        # the padded state inside the call; not the caller's `hidden` array).
        input_output_aliases={0: 0},
        compiler_params=pltpu.CompilerParams(
            dimension_semantics=("parallel",),   # batch axis -> both TCs on v7x
            vmem_limit_bytes=vmem_limit,
        ),
        cost_estimate=pl.CostEstimate(
            flops=flops,
            transcendentals=transcendentals,
            bytes_accessed=bytes_accessed,
        ),
    )(h_p, w1_p, b1_p, w2_p, b2_p)

    # TODO(synk): when called repeatedly from an outer loop, keep the state in
    # its padded (Bp, Hp) layout across calls instead of pad/slice every call.
    return out_p[:B, :H]


def init_params(key, hidden_dim):
    """Deterministic init matching nn.init.normal_(std=0.1), bias=0."""
    mid_dim = max(hidden_dim * 2, 60)
    k1, k2 = jax.random.split(key)
    # PyTorch Linear weight is (out, in); we store transposed (in, out).
    w1 = (0.1 * jax.random.normal(k1, (mid_dim, hidden_dim), jnp.float32)).T
    b1 = jnp.zeros((1, mid_dim), jnp.float32)
    w2 = (0.1 * jax.random.normal(k2, (hidden_dim, mid_dim), jnp.float32)).T
    b2 = jnp.zeros((1, hidden_dim), jnp.float32)
    return w1, b1, w2, b2


def reference_forward(hidden, w1, b1, w2, b2):
    z1 = jnp.tanh(hidden @ w1 + b1)
    return jnp.tanh(z1 @ w2 + b2)


if __name__ == "__main__":
    key = jax.random.PRNGKey(0)
    k_param, k_hidden, k_input, k_hidden2 = jax.random.split(key, 4)

    batch = 8
    hidden_dim = 32          # -> mid_dim = max(64, 60) = 64
    feature_dim = 16         # unused by forward, kept for signature parity

    w1, b1, w2, b2 = init_params(k_param, hidden_dim)

    hidden = jax.random.normal(k_hidden, (batch, hidden_dim), jnp.float32)
    inp = jax.random.normal(k_input, (batch, feature_dim), jnp.float32)
    t = jnp.float32(0.0)
    dt = jnp.float32(0.1)

    # Single application == ODENetH.forward (single-chain path, TB=8).
    out = odeneth_forward(inp, t, dt, hidden, w1, b1, w2, b2)
    out = jax.block_until_ready(out)
    ref = reference_forward(hidden, w1, b1, w2, b2)
    assert out.shape == (batch, hidden_dim)
    assert jnp.allclose(out, ref, atol=1e-5, rtol=1e-5), "mismatch vs reference"

    # Larger batch exercises the 2-tile grid + interleaved sub-tile path.
    batch2 = 32
    hidden2 = jax.random.normal(k_hidden2, (batch2, hidden_dim), jnp.float32)
    inp2 = jnp.zeros((batch2, feature_dim), jnp.float32)
    out2 = jax.block_until_ready(
        odeneth_forward(inp2, t, dt, hidden2, w1, b1, w2, b2))
    ref2 = reference_forward(hidden2, w1, b1, w2, b2)
    assert out2.shape == (batch2, hidden_dim)
    assert jnp.allclose(out2, ref2, atol=1e-5, rtol=1e-5), "mismatch (2-tile path)"

    # Fused multi-step path: one launch, time loop + resident weights in-kernel.
    n_steps = 8
    out_n = jax.block_until_ready(
        odeneth_forward(inp, t, dt, hidden, w1, b1, w2, b2, n_steps=n_steps))
    ref_n = hidden
    for _ in range(n_steps):
        ref_n = reference_forward(ref_n, w1, b1, w2, b2)
    assert jnp.allclose(out_n, ref_n, atol=1e-4, rtol=1e-4), "mismatch (fused steps)"

    print("KERNEL_OK")
</pallas_src>

<mosaic_0001>
module attributes {stable_mosaic.version = 11 : i64} {
  func.func @odeneth_kernel(%arg0: i32, %arg1: memref<8x128xf32, #tpu.memory_space<vmem>>, %arg2: memref<128x128xf32, #tpu.memory_space<vmem>>, %arg3: memref<1x128xf32, #tpu.memory_space<vmem>>, %arg4: memref<128x128xf32, #tpu.memory_space<vmem>>, %arg5: memref<1x128xf32, #tpu.memory_space<vmem>>, %arg6: memref<8x128xf32, #tpu.memory_space<vmem>>) attributes {dimension_semantics = [#tpu.dimension_semantics<parallel>], iteration_bounds = array<i64: 1>, scalar_prefetch = 0 : i64, scratch_operands = 0 : i64, tpu.core_type = #tpu.core_type<tc>, window_params = [{transform_indices = @transform_0, window_bounds = array<i64: 8, 128>}, {pipeline_mode = #tpu.pipeline_mode<synchronous>, transform_indices = @transform_1, window_bounds = array<i64: 128, 128>}, {pipeline_mode = #tpu.pipeline_mode<synchronous>, transform_indices = @transform_2, window_bounds = array<i64: 1, 128>}, {pipeline_mode = #tpu.pipeline_mode<synchronous>, transform_indices = @transform_3, window_bounds = array<i64: 128, 128>}, {pipeline_mode = #tpu.pipeline_mode<synchronous>, transform_indices = @transform_4, window_bounds = array<i64: 1, 128>}, {transform_indices = @transform_5, window_bounds = array<i64: 8, 128>}]} {
    %c0 = arith.constant 0 : index
    %c0_0 = arith.constant 0 : index
    %0 = vector.load %arg2[%c0, %c0_0] : memref<128x128xf32, #tpu.memory_space<vmem>>, vector<128x128xf32>
    %c0_1 = arith.constant 0 : index
    %c0_2 = arith.constant 0 : index
    %1 = vector.load %arg4[%c0_1, %c0_2] : memref<128x128xf32, #tpu.memory_space<vmem>>, vector<128x128xf32>
    %c0_3 = arith.constant 0 : index
    %c0_4 = arith.constant 0 : index
    %2 = vector.load %arg3[%c0_3, %c0_4] : memref<1x128xf32, #tpu.memory_space<vmem>>, vector<1x128xf32>
    %c0_5 = arith.constant 0 : index
    %c0_6 = arith.constant 0 : index
    %3 = vector.load %arg5[%c0_5, %c0_6] : memref<1x128xf32, #tpu.memory_space<vmem>>, vector<1x128xf32>
    %c0_7 = arith.constant 0 : index
    %c0_8 = arith.constant 0 : index
    %4 = vector.load %arg1[%c0_7, %c0_8] : memref<8x128xf32, #tpu.memory_space<vmem>>, vector<8x128xf32>
    %cst = arith.constant dense<0.000000e+00> : vector<8x128xf32>
    %5 = tpu.matmul %4, %0, %cst {dimension_numbers = #tpu.dot_dimension_numbers<[1], [0], [0], [1], [0, 0, 1, 1], [], []>} : vector<8x128xf32>, vector<128x128xf32>, vector<8x128xf32> -> vector<8x128xf32>
    %6 = vector.broadcast %2 : vector<1x128xf32> to vector<8x128xf32>
    %7 = arith.addf %5, %6 : vector<8x128xf32>
    %8 = math.tanh %7 : vector<8x128xf32>
    %cst_9 = arith.constant dense<0.000000e+00> : vector<8x128xf32>
    %9 = tpu.matmul %8, %1, %cst_9 {dimension_numbers = #tpu.dot_dimension_numbers<[1], [0], [0], [1], [0, 0, 1, 1], [], []>} : vector<8x128xf32>, vector<128x128xf32>, vector<8x128xf32> -> vector<8x128xf32>
    %10 = vector.broadcast %3 : vector<1x128xf32> to vector<8x128xf32>
    %11 = arith.addf %9, %10 : vector<8x128xf32>
    %12 = math.tanh %11 : vector<8x128xf32>
    %c0_10 = arith.constant 0 : index
    %c0_11 = arith.constant 0 : index
    %13 = vector.load %arg6[%c0_10, %c0_11] : memref<8x128xf32, #tpu.memory_space<vmem>>, vector<8x128xf32>
    tpu.vector_store %arg6[%c0_10, %c0_11], %12 {strides = array<i32>} : memref<8x128xf32, #tpu.memory_space<vmem>>, vector<8x128xf32>,
    return
  }
  func.func @transform_0(%arg0: i32) -> (i32, i32) {
    %c0_i32 = arith.constant 0 : i32
    %c0_i32_0 = arith.constant 0 : i32
    return %arg0, %c0_i32 : i32, i32
  }
  func.func @transform_1(%arg0: i32) -> (i32, i32) {
    %c0_i32 = arith.constant 0 : i32
    %c0_i32_0 = arith.constant 0 : i32
    %c0_i32_1 = arith.constant 0 : i32
    return %c0_i32, %c0_i32_0 : i32, i32
  }
  func.func @transform_2(%arg0: i32) -> (i32, i32) {
    %c0_i32 = arith.constant 0 : i32
    %c0_i32_0 = arith.constant 0 : i32
    %c0_i32_1 = arith.constant 0 : i32
    return %c0_i32, %c0_i32_0 : i32, i32
  }
  func.func @transform_3(%arg0: i32) -> (i32, i32) {
    %c0_i32 = arith.constant 0 : i32
    %c0_i32_0 = arith.constant 0 : i32
    %c0_i32_1 = arith.constant 0 : i32
    return %c0_i32, %c0_i32_0 : i32, i32
  }
  func.func @transform_4(%arg0: i32) -> (i32, i32) {
    %c0_i32 = arith.constant 0 : i32
    %c0_i32_0 = arith.constant 0 : i32
    %c0_i32_1 = arith.constant 0 : i32
    return %c0_i32, %c0_i32_0 : i32, i32
  }
  func.func @transform_5(%arg0: i32) -> (i32, i32) {
    %c0_i32 = arith.constant 0 : i32
    %c0_i32_0 = arith.constant 0 : i32
    return %arg0, %c0_i32 : i32, i32
  }
}

</mosaic_0001>

<bundles_post_ra>
// kernel: odeneth_forward.1
= control target key start
LH: loop header
LB: loop body
LE: loop exit
PB: predicated region body
PF: predicated region fallthrough
CT: control target
= control target key end

     0   :  { %v375_v0 = vmov 0.0|0.0   ;;  %vm376_vm0 = vmmov 0   ;;  %v377_v4 = vmov 0.0   ;;  %s532_s1 = inlined_call_operand.vmem [shape: f32[128,128], index: 1, kind: input, shape index: {}]   ;;  %s533_s3 = inlined_call_operand.vmem [shape: f32[128,128], index: 3, kind: input, shape index: {}]   ;;  %s534_s0 = inlined_call_operand.vmem [shape: f32[8,128], index: 0, kind: input, shape index: {}, may-alias: {0,5}]   ;;  %s535_s2 = inlined_call_operand.vmem [shape: f32[1,128], index: 2, kind: input, shape index: {}]   ;;  %s536_s4 = inlined_call_operand.vmem [shape: f32[1,128], index: 4, kind: input, shape index: {}]   ;;  %s537_s5 = inlined_call_operand.vmem [shape: f32[8,128], index: 5, kind: output, shape index: {}, may-alias: {0,5}]  }
   0x1   :  { %320 = vmatprep.subr.bf16.mxu0 %v375_v0  ;;  %v20_v1 = vld [vmem:[%s532_s1] sm:$0xff]  ;;  %v21_v2 = vld [vmem:[%s532_s1 + $0x8] sm:$0xff]  ;;  %v22_v3 = vld [vmem:[%s532_s1 + $0x10] sm:$0xff]  ;;  %282 = vmatprep.mubr.msk.f32.mxu0 %vm376_vm0, %v377_v4 }
   0x2   :  { %v321_v5 = vpack.c.bf16 %v21_v2, %v20_v1  ;;  %v23_v6 = vld [vmem:[%s532_s1 + $0x18] sm:$0xff]  ;;  %344 = vmatprep.subr.bf16.mxu1 %v375_v0  ;;  %317 = vmatprep.mubr.msk.f32.mxu1 %vm376_vm0, %v377_v4  ;;  %v24_v8 = vld [vmem:[%s532_s1 + $0x20] sm:$0xff]  ;;  %v25_v9 = vld [vmem:[%s532_s1 + $0x28] sm:$0xff] }
   0x3   :  { %v324_v7 = vpack.c.bf16 %v23_v6, %v22_v3  ;;  %v36_v10 = vld [vmem:[%s533_s3] sm:$0xff]  ;;  %v37_v11 = vld [vmem:[%s533_s3 + $0x8] sm:$0xff]  ;;  %v38_v12 = vld [vmem:[%s533_s3 + $0x10] sm:$0xff]  ;;  %v327_v14 = vpack.c.bf16 %v25_v9, %v24_v8 }
   0x4   :  { %322 = vmatpush3.bf16.msra.mxu0 %v321_v5  ;;  %v39_v13 = vld [vmem:[%s533_s3 + $0x18] sm:$0xff]  ;;  %v345_v15 = vpack.c.bf16 %v37_v11, %v36_v10  ;;  %v26_v16 = vld [vmem:[%s532_s1 + $0x30] sm:$0xff]  ;;  %v40_v19 = vld [vmem:[%s533_s3 + $0x20] sm:$0xff] }
   0x5   :  { %323 = vmatprep.subr.bf16.mxu0 %v375_v0  ;;  %v27_v17 = vld [vmem:[%s532_s1 + $0x38] sm:$0xff]  ;;  %v348_v18 = vpack.c.bf16 %v39_v13, %v38_v12  ;;  %v41_v20 = vld [vmem:[%s533_s3 + $0x28] sm:$0xff]  ;;  %v28_v22 = vld [vmem:[%s532_s1 + $0x40] sm:$0xff] }
   0x6   :  { %346 = vmatpush3.bf16.msra.mxu1 %v345_v15  ;;  %v330_v21 = vpack.c.bf16 %v27_v17, %v26_v16  ;;  %v29_v23 = vld [vmem:[%s532_s1 + $0x48] sm:$0xff]  ;;  %v351_v24 = vpack.c.bf16 %v41_v20, %v40_v19  ;;  %v42_v25 = vld [vmem:[%s533_s3 + $0x30] sm:$0xff]  ;;  %v43_v26 = vld [vmem:[%s533_s3 + $0x38] sm:$0xff] }
   0x7   :  { %347 = vmatprep.subr.bf16.mxu1 %v375_v0  ;;  %v333_v27 = vpack.c.bf16 %v29_v23, %v28_v22  ;;  %v30_v28 = vld [vmem:[%s532_s1 + $0x50] sm:$0xff]  ;;  %v31_v29 = vld [vmem:[%s532_s1 + $0x58] sm:$0xff]  ;;  %v354_v30 = vpack.c.bf16 %v43_v26, %v42_v25  ;;  %v44_v31 = vld [vmem:[%s533_s3 + $0x40] sm:$0xff] }
   0x8   :  { %325 = vmatpush3.bf16.msra.mxu0 %v324_v7  ;;  %v45_v32 = vld [vmem:[%s533_s3 + $0x48] sm:$0xff]  ;;  %v336_v33 = vpack.c.bf16 %v31_v29, %v30_v28  ;;  %v32_v34 = vld [vmem:[%s532_s1 + $0x60] sm:$0xff]  ;;  %v34_v38 = vld [vmem:[%s532_s1 + $0x70] sm:$0xff] }
   0x9   :  { %326 = vmatprep.subr.bf16.mxu0 %v375_v0  ;;  %v33_v35 = vld [vmem:[%s532_s1 + $0x68] sm:$0xff]  ;;  %v357_v36 = vpack.c.bf16 %v45_v32, %v44_v31  ;;  %v35_v39 = vld [vmem:[%s532_s1 + $0x78] sm:$0xff]  ;;  %v54_v41 = vld [vmem:[%s534_s0] sm:$0xff] }
   0xa   :  { %349 = vmatpush3.bf16.msra.mxu1 %v348_v18  ;;  %v339_v37 = vpack.c.bf16 %v33_v35, %v32_v34  ;;  %v342_v40 = vpack.c.bf16 %v35_v39, %v34_v38  ;;  %v46_v42 = vld [vmem:[%s533_s3 + $0x50] sm:$0xff]  ;;  %v47_v43 = vld [vmem:[%s533_s3 + $0x58] sm:$0xff]  ;;  %v48_v45 = vld [vmem:[%s533_s3 + $0x60] sm:$0xff] }
   0xb   :  { %350 = vmatprep.subr.bf16.mxu1 %v375_v0  ;;  %v360_v44 = vpack.c.bf16 %v47_v43, %v46_v42  ;;  %v49_v46 = vld [vmem:[%s533_s3 + $0x68] sm:$0xff]  ;;  %v50_v48 = vld [vmem:[%s533_s3 + $0x70] sm:$0xff]  ;;  %v51_v49 = vld [vmem:[%s533_s3 + $0x78] sm:$0xff] }
   0xc   :  { %328 = vmatpush3.bf16.msra.mxu0 %v327_v14  ;;  %v363_v47 = vpack.c.bf16 %v49_v46, %v48_v45  ;;  %v366_v50 = vpack.c.bf16 %v51_v49, %v50_v48  ;;  %v214_v51 = vld [vmem:[%s535_s2] ss:$0 sm:$0xff] }
   0xd   :  { %329 = vmatprep.subr.bf16.mxu0 %v375_v0  ;;  %v215_v56 = vld [vmem:[%s536_s4] ss:$0 sm:$0xff] }
   0xe   :  { %352 = vmatpush3.bf16.msra.mxu1 %v351_v24 }
   0xf   :  { %353 = vmatprep.subr.bf16.mxu1 %v375_v0 }
  0x10   :  { %331 = vmatpush3.bf16.msra.mxu0 %v330_v21 }
  0x11   :  { %332 = vmatprep.subr.bf16.mxu0 %v375_v0 }
  0x12   :  { %355 = vmatpush3.bf16.msra.mxu1 %v354_v30 }
  0x13   :  { %356 = vmatprep.subr.bf16.mxu1 %v375_v0 }
  0x14   :  { %334 = vmatpush3.bf16.msra.mxu0 %v333_v27 }
  0x15   :  { %335 = vmatprep.subr.bf16.mxu0 %v375_v0 }
  0x16   :  { %358 = vmatpush3.bf16.msra.mxu1 %v357_v36 }
  0x17   :  { %359 = vmatprep.subr.bf16.mxu1 %v375_v0 }
  0x18   :  { %337 = vmatpush3.bf16.msra.mxu0 %v336_v33 }
  0x19   :  { %338 = vmatprep.subr.bf16.mxu0 %v375_v0 }
  0x1a   :  { %361 = vmatpush3.bf16.msra.mxu1 %v360_v44 }
  0x1b   :  { %362 = vmatprep.subr.bf16.mxu1 %v375_v0 }
  0x1c   :  { %340 = vmatpush3.bf16.msra.mxu0 %v339_v37 }
  0x1d   :  { %341 = vmatprep.subr.bf16.mxu0 %v375_v0 }
  0x1e   :  { %364 = vmatpush3.bf16.msra.mxu1 %v363_v47 }
  0x1f   :  { %365 = vmatprep.subr.bf16.mxu1 %v375_v0 }
  0x20   :  { %343 = vmatpush3.bf16.msra.mxu0 %v342_v40 }
  0x22   :  { %367 = vmatpush3.bf16.msra.mxu1 %v366_v50 }
  0x23   :  { %283 = vmatmul.mubr.f32.vlgmr.msra.gmra.mrb[0].mxu0 %v54_v41 }
  0xf6   :  { %v127_v52 = vpop.f32.mrb[0].mxu0 }
  0xf7   :  { %v128_v53 = vadd.f32 %v214_v51, %v127_v52  ;;  %v284_v54 = vpop.f32.mrb[1].mxu0 }
  0xf9   :  { %371 = vtanh.f32 %v128_v53 }
 0x103   :  { %v372_v55 = vpop.eup %371 }
 0x104   :  { %318 = vmatmul.mubr.f32.vlgmr.msra.gmra.mrb[0].mxu1 %v372_v55 }
 0x1d7   :  { %v204_v57 = vpop.f32.mrb[0].mxu1 }
 0x1d8   :  { %v205_v58 = vadd.f32 %v215_v56, %v204_v57  ;;  %v319_v59 = vpop.f32.mrb[1].mxu1 }
 0x1da   :  { %373 = vtanh.f32 %v205_v58 }
 0x1e4   :  { %v374_v60 = vpop.eup %373 }
 0x1e5   :  { %209 = vst [vmem:[%s537_s5] sm:$0xff] %v374_v60 }

</bundles_post_ra>
